<compile_context>
chip_gen: v7x
topology: tpu7x:2x2x1
jax: 0.10.0
libtpu: 0.0.40
codegen_flags: <defaults>
</compile_context>

<pallas_src>
import math
from functools import partial

import jax
import jax.numpy as jnp
from jax.experimental import pallas as pl
from jax.experimental.pallas import tpu as pltpu


def _self_gram_f32(x):
    # x: (L, Dh) -> x @ x^T with f32 accumulation (no explicit transpose op).
    return jax.lax.dot_general(
        x, x, (((1,), (1,)), ((), ())), preferred_element_type=jnp.float32)


# ----------------------------------------------------------------------------
# Kernel 1: fused pair interaction (teacher + student), grid = (B, H)
# ----------------------------------------------------------------------------
def _pair_kernel(t_ref, s_ref, mrow_ref, mcol_ref,
                 pair_sq_ref, gscore_ref, lscore_ref, *, scale):
    h = pl.program_id(1)

    @pl.when(h == 0)
    def _():
        pair_sq_ref[...] = jnp.zeros_like(pair_sq_ref)
        gscore_ref[...] = jnp.zeros_like(gscore_ref)
        lscore_ref[...] = jnp.zeros_like(lscore_ref)

    # pairwise attention mask built in-kernel (outer product, VPU filler)
    m_row = mrow_ref[0]                       # (1, L)
    m_col = mcol_ref[0]                       # (L, 1)
    mext = m_col * m_row                      # (L, L)

    th = t_ref[0, 0]                          # (L, Dh) bf16
    sh = s_ref[0, 0]                          # (L, Dh) bf16

    t_scores = _self_gram_f32(th) * scale     # (L, L) f32
    s_scores = _self_gram_f32(sh) * scale

    t_sm = t_scores * mext
    s_sm = s_scores * mext

    # MSE numerator accumulated in-kernel (no (B,H,L,L) writeback)
    diff = s_sm - t_sm
    pair_sq_ref[...] += jnp.sum(diff * diff)

    # teacher-only masked softmax over the key axis
    t_masked = t_sm + (mext - 1.0) * 10000.0
    mx = jnp.max(t_masked, axis=-1, keepdims=True)
    e = jnp.exp(t_masked - mx)
    inv = pl.reciprocal(jnp.sum(e, axis=-1, keepdims=True), approx=True)
    p = e * inv * mext                        # (L, L)

    # global score: sum over query axis, accumulated over heads
    gscore_ref[...] += jnp.sum(p, axis=0, keepdims=True)[None]     # (1,1,L)

    # local score: accumulated over heads with the diagonal zeroed in-kernel
    L = p.shape[0]
    row = jax.lax.broadcasted_iota(jnp.int32, (L, L), 0)
    col = jax.lax.broadcasted_iota(jnp.int32, (L, L), 1)
    off_diag = (row != col).astype(jnp.float32)
    lscore_ref[...] += (p * off_diag)[None]                        # (1,L,L)


def _pair_call(t_hidden, s_hidden, mask_row, mask_col, scale):
    B, H, L, Dh = t_hidden.shape
    kernel = partial(_pair_kernel, scale=scale)
    return pl.pallas_call(
        kernel,
        out_shape=(
            jax.ShapeDtypeStruct((B, 1, 1), jnp.float32),   # sum((s-t)^2) per batch
            jax.ShapeDtypeStruct((B, 1, L), jnp.float32),   # teacher global score
            jax.ShapeDtypeStruct((B, L, L), jnp.float32),   # teacher local score
        ),
        grid=(B, H),
        in_specs=[
            pl.BlockSpec((1, 1, L, Dh), lambda b, h: (b, h, 0, 0)),
            pl.BlockSpec((1, 1, L, Dh), lambda b, h: (b, h, 0, 0)),
            pl.BlockSpec((1, 1, L), lambda b, h: (b, 0, 0)),
            pl.BlockSpec((1, L, 1), lambda b, h: (b, 0, 0)),
        ],
        out_specs=(
            pl.BlockSpec((1, 1, 1), lambda b, h: (b, 0, 0)),
            pl.BlockSpec((1, 1, L), lambda b, h: (b, 0, 0)),
            pl.BlockSpec((1, L, L), lambda b, h: (b, 0, 0)),
        ),
        compiler_params=pltpu.CompilerParams(
            dimension_semantics=("parallel", "arbitrary")),
    )(t_hidden, s_hidden, mask_row, mask_col)


# ----------------------------------------------------------------------------
# Kernel 2: fused triplet-angle loss (smooth-L1 sum + mask sum per batch)
# ----------------------------------------------------------------------------
def _triplet_kernel(t_sd_ref, s_sd_ref, maskpair_ref, l1_ref, msum_ref):
    t_sd = t_sd_ref[0]                        # (k1, k2, D) f32
    s_sd = s_sd_ref[0]
    mp = maskpair_ref[0]                      # (k1, k2), values in {0,1,2}

    k2 = t_sd.shape[1]
    row = jax.lax.broadcasted_iota(jnp.int32, (k2, k2), 0)
    col = jax.lax.broadcasted_iota(jnp.int32, (k2, k2), 1)
    off_diag = (row != col).astype(jnp.float32)
    attn_ext = ((mp[:, :, None] * mp[:, None, :]) == 4.0).astype(jnp.float32)

    def masked_angle(sd):
        # F.normalize(p=2, eps=1e-12): 1/max(||v||,eps) == rsqrt(max(||v||^2, eps^2))
        sqn = jnp.sum(sd * sd, axis=-1, keepdims=True)
        nsd = sd * jax.lax.rsqrt(jnp.maximum(sqn, 1e-24))
        angle = jnp.einsum('ijd,ikd->ijk', nsd, nsd,
                           preferred_element_type=jnp.float32)
        # keep fp32 so the original angle.ne(0) semantics are preserved
        nz = (angle != 0.0).astype(jnp.float32) * off_diag[None, :, :]
        mext = attn_ext * nz
        return angle * mext, mext

    t_angle, _ = masked_angle(t_sd)
    s_angle, s_mask = masked_angle(s_sd)

    d = s_angle - t_angle
    ad = jnp.abs(d)
    sl1 = jnp.where(ad < 1.0, 0.5 * d * d, ad - 0.5)   # smooth-L1, beta=1.0
    l1_ref[...] = jnp.sum(sl1, keepdims=True)
    msum_ref[...] = jnp.sum(s_mask, keepdims=True)


def _triplet_call(t_sd, s_sd, mask_pair):
    B, k1, k2, D = t_sd.shape
    return pl.pallas_call(
        _triplet_kernel,
        out_shape=(
            jax.ShapeDtypeStruct((B, 1, 1), jnp.float32),   # smooth-L1 sum
            jax.ShapeDtypeStruct((B, 1, 1), jnp.float32),   # s_mask sum
        ),
        grid=(B,),
        in_specs=[
            pl.BlockSpec((1, k1, k2, D), lambda b: (b, 0, 0, 0)),
            pl.BlockSpec((1, k1, k2, D), lambda b: (b, 0, 0, 0)),
            pl.BlockSpec((1, k1, k2), lambda b: (b, 0, 0)),
        ],
        out_specs=(
            pl.BlockSpec((1, 1, 1), lambda b: (b, 0, 0)),
            pl.BlockSpec((1, 1, 1), lambda b: (b, 0, 0)),
        ),
        compiler_params=pltpu.CompilerParams(
            dimension_semantics=("parallel",)),
    )(t_sd, s_sd, mask_pair)


# ----------------------------------------------------------------------------
# Plain-JAX glue (reshape, top-k, gathers, final scalar arithmetic)
# ----------------------------------------------------------------------------
def _pair_interaction_fused(t_rep, s_rep, mask_f, n_heads, k1, k2):
    B, L, D = t_rep.shape
    Dh = D // n_heads
    scale = 1.0 / math.sqrt(Dh)

    def to_heads(rep):
        # bf16 operands for the MXU; accumulation stays f32 in-kernel
        return rep.reshape(B, L, n_heads, Dh).transpose(0, 2, 1, 3).astype(
            jnp.bfloat16)

    mask_row = mask_f[:, None, :]          # (B, 1, L)
    mask_col = mask_f[:, :, None]          # (B, L, 1)

    pair_sq, gscore, lscore = _pair_call(
        to_heads(t_rep), to_heads(s_rep), mask_row, mask_col, scale)

    gscore = gscore[:, 0, :]                               # (B, L)
    global_topk = jax.lax.top_k(gscore, k1)[1]             # (B, k1)

    # gather the k1 selected rows first, then the (much smaller) top-k
    rows = jnp.take_along_axis(
        lscore, global_topk[:, :, None], axis=1)           # (B, k1, L)
    local_topk = jax.lax.top_k(rows, k2)[1]                # (B, k1, k2)

    return jnp.sum(pair_sq), global_topk, local_topk


def _triplet_loss(t_rep, s_rep, mask_f, global_topk, local_topk):
    B, L, D = t_rep.shape
    k1 = global_topk.shape[1]

    def gather_sd(rep):
        g_idx = jnp.broadcast_to(global_topk[:, :, None], (B, k1, D))
        h1 = jnp.take_along_axis(rep, g_idx, axis=1)               # (B,k1,D)
        hloc = jax.vmap(lambda r, idx: r[idx])(rep, local_topk)    # (B,k1,k2,D)
        return h1[:, :, None, :] - hloc                            # (B,k1,k2,D)

    mask1 = jnp.take_along_axis(mask_f, global_topk, axis=1)       # (B, k1)
    mloc = jax.vmap(lambda m, idx: m[idx])(mask_f, local_topk)     # (B,k1,k2)
    mask_pair = mask1[:, :, None] + mloc                           # (B,k1,k2)

    l1_sum, msum = _triplet_call(gather_sd(t_rep), gather_sd(s_rep), mask_pair)
    return jnp.sum(l1_sum) / jnp.sum(msum)


def token_phrase_loss(t_rep, s_rep, attention_mask, n_relation_heads, k1, k2):
    t_rep = t_rep.astype(jnp.float32)
    s_rep = s_rep.astype(jnp.float32)
    mask_f = attention_mask.astype(jnp.float32)
    B, L, D = t_rep.shape
    k1 = min(k1, L)
    k2 = min(k2, L)

    # sum over (B, H, L, L) of m⊗m == H * sum_b (sum_l m)^2  (no LxL mask in HBM)
    sum_mask_ext = n_relation_heads * jnp.sum(jnp.sum(mask_f, axis=1) ** 2)

    pair_sq_sum, t_gk, t_lk = _pair_interaction_fused(
        t_rep, s_rep, mask_f, n_relation_heads, k1, k2)
    loss_pair = pair_sq_sum / sum_mask_ext

    # triplet angle: both sides use the teacher's top-k indices (1 head)
    loss_triplet = _triplet_loss(t_rep, s_rep, mask_f, t_gk, t_lk)

    return loss_pair + loss_triplet


if __name__ == "__main__":
    # TokenPhraseLoss(n_relation_heads=4, k1=4, k2=4)
    B, L, D, H = 2, 8, 32, 4
    K1, K2 = 4, 4

    key = jax.random.PRNGKey(0)
    kt, ks = jax.random.split(key)
    t_rep = jax.random.normal(kt, (B, L, D), dtype=jnp.float32)
    s_rep = jax.random.normal(ks, (B, L, D), dtype=jnp.float32)
    attention_mask = jnp.array(
        [[1, 1, 1, 1, 1, 1, 0, 0],
         [1, 1, 1, 1, 1, 1, 1, 1]], dtype=jnp.float32)

    loss_fn = jax.jit(token_phrase_loss, static_argnums=(3, 4, 5))
    loss = loss_fn(t_rep, s_rep, attention_mask, H, K1, K2)
    loss = jax.block_until_ready(loss)
    assert loss.shape == () and bool(jnp.isfinite(loss))
    print("KERNEL_OK")
</pallas_src>

<mosaic_0001>
module attributes {stable_mosaic.version = 11 : i64} {
  func.func @_pair_kernel(%arg0: i32, %arg1: i32, %arg2: memref<1x1x8x8xbf16, #tpu.memory_space<vmem>>, %arg3: memref<1x1x8x8xbf16, #tpu.memory_space<vmem>>, %arg4: memref<1x1x8xf32, #tpu.memory_space<vmem>>, %arg5: memref<1x8x1xf32, #tpu.memory_space<vmem>>, %arg6: memref<1x1x1xf32, #tpu.memory_space<vmem>>, %arg7: memref<1x1x8xf32, #tpu.memory_space<vmem>>, %arg8: memref<1x8x8xf32, #tpu.memory_space<vmem>>) attributes {dimension_semantics = [#tpu.dimension_semantics<parallel>, #tpu.dimension_semantics<arbitrary>], iteration_bounds = array<i64: 2, 4>, scalar_prefetch = 0 : i64, scratch_operands = 0 : i64, tpu.core_type = #tpu.core_type<tc>, window_params = [{transform_indices = @transform_0, window_bounds = array<i64: 1, 1, 8, 8>}, {transform_indices = @transform_1, window_bounds = array<i64: 1, 1, 8, 8>}, {transform_indices = @transform_2, window_bounds = array<i64: 1, 1, 8>}, {transform_indices = @transform_3, window_bounds = array<i64: 1, 8, 1>}, {transform_indices = @transform_4, window_bounds = array<i64: 1, 1, 1>}, {transform_indices = @transform_5, window_bounds = array<i64: 1, 1, 8>}, {transform_indices = @transform_6, window_bounds = array<i64: 1, 8, 8>}]} {
    %c0_i32 = arith.constant 0 : i32
    %0 = arith.cmpi eq, %arg1, %c0_i32 : i32
    %1 = arith.extui %0 : i1 to i32
    %c0_i32_0 = arith.constant 0 : i32
    %2 = arith.cmpi ne, %1, %c0_i32_0 : i32
    scf.if %2 {
      %cst_41 = arith.constant 0.000000e+00 : f32
      %64 = vector.broadcast %cst_41 : f32 to vector<1x1x1xf32>
      %c0_42 = arith.constant 0 : index
      %c0_43 = arith.constant 0 : index
      %c0_44 = arith.constant 0 : index
      %65 = vector.load %arg6[%c0_42, %c0_43, %c0_44] : memref<1x1x1xf32, #tpu.memory_space<vmem>>, vector<1x1x1xf32>
      tpu.vector_store %arg6[%c0_42, %c0_43, %c0_44], %64 {strides = array<i32>} : memref<1x1x1xf32, #tpu.memory_space<vmem>>, vector<1x1x1xf32>,
      %cst_45 = arith.constant 0.000000e+00 : f32
      %66 = vector.broadcast %cst_45 : f32 to vector<1x1x8xf32>
      %c0_46 = arith.constant 0 : index
      %c0_47 = arith.constant 0 : index
      %c0_48 = arith.constant 0 : index
      %67 = vector.load %arg7[%c0_46, %c0_47, %c0_48] : memref<1x1x8xf32, #tpu.memory_space<vmem>>, vector<1x1x8xf32>
      tpu.vector_store %arg7[%c0_46, %c0_47, %c0_48], %66 {strides = array<i32>} : memref<1x1x8xf32, #tpu.memory_space<vmem>>, vector<1x1x8xf32>,
      %cst_49 = arith.constant 0.000000e+00 : f32
      %68 = vector.broadcast %cst_49 : f32 to vector<1x8x8xf32>
      %c0_50 = arith.constant 0 : index
      %c0_51 = arith.constant 0 : index
      %c0_52 = arith.constant 0 : index
      %69 = vector.load %arg8[%c0_50, %c0_51, %c0_52] : memref<1x8x8xf32, #tpu.memory_space<vmem>>, vector<1x8x8xf32>
      tpu.vector_store %arg8[%c0_50, %c0_51, %c0_52], %68 {strides = array<i32>} : memref<1x8x8xf32, #tpu.memory_space<vmem>>, vector<1x8x8xf32>,
    } else {
    }
    %c0 = arith.constant 0 : index
    %c0_1 = arith.constant 0 : index
    %c0_2 = arith.constant 0 : index
    %3 = vector.load %arg4[%c0, %c0_1, %c0_2] : memref<1x1x8xf32, #tpu.memory_space<vmem>>, vector<1x1x8xf32>
    %4 = vector.shape_cast %3 : vector<1x1x8xf32> to vector<1x8xf32>
    %c0_3 = arith.constant 0 : index
    %c0_4 = arith.constant 0 : index
    %c0_5 = arith.constant 0 : index
    %5 = vector.load %arg5[%c0_3, %c0_4, %c0_5] : memref<1x8x1xf32, #tpu.memory_space<vmem>>, vector<1x8x1xf32>
    %6 = vector.shape_cast %5 : vector<1x8x1xf32> to vector<8x1xf32>
    %7 = vector.broadcast %6 : vector<8x1xf32> to vector<8x8xf32>
    %8 = vector.broadcast %4 : vector<1x8xf32> to vector<8x8xf32>
    %9 = arith.mulf %7, %8 : vector<8x8xf32>
    %c0_6 = arith.constant 0 : index
    %c0_7 = arith.constant 0 : index
    %c0_8 = arith.constant 0 : index
    %c0_9 = arith.constant 0 : index
    %10 = vector.load %arg2[%c0_6, %c0_7, %c0_8, %c0_9] : memref<1x1x8x8xbf16, #tpu.memory_space<vmem>>, vector<1x1x8x8xbf16>
    %11 = vector.shape_cast %10 : vector<1x1x8x8xbf16> to vector<8x8xbf16>
    %c0_10 = arith.constant 0 : index
    %c0_11 = arith.constant 0 : index
    %c0_12 = arith.constant 0 : index
    %c0_13 = arith.constant 0 : index
    %12 = vector.load %arg3[%c0_10, %c0_11, %c0_12, %c0_13] : memref<1x1x8x8xbf16, #tpu.memory_space<vmem>>, vector<1x1x8x8xbf16>
    %13 = vector.shape_cast %12 : vector<1x1x8x8xbf16> to vector<8x8xbf16>
    %cst = arith.constant dense<0.000000e+00> : vector<8x8xf32>
    %14 = tpu.matmul %11, %11, %cst {dimension_numbers = #tpu.dot_dimension_numbers<[1], [1], [0], [0], [0, 0, 1, 0], [], []>} : vector<8x8xbf16>, vector<8x8xbf16>, vector<8x8xf32> -> vector<8x8xf32>
    %cst_14 = arith.constant 0.353553385 : f32
    %15 = vector.broadcast %cst_14 : f32 to vector<8x8xf32>
    %16 = arith.mulf %14, %15 : vector<8x8xf32>
    %cst_15 = arith.constant dense<0.000000e+00> : vector<8x8xf32>
    %17 = tpu.matmul %13, %13, %cst_15 {dimension_numbers = #tpu.dot_dimension_numbers<[1], [1], [0], [0], [0, 0, 1, 0], [], []>} : vector<8x8xbf16>, vector<8x8xbf16>, vector<8x8xf32> -> vector<8x8xf32>
    %cst_16 = arith.constant 0.353553385 : f32
    %18 = vector.broadcast %cst_16 : f32 to vector<8x8xf32>
    %19 = arith.mulf %17, %18 : vector<8x8xf32>
    %20 = arith.mulf %16, %9 : vector<8x8xf32>
    %21 = arith.mulf %19, %9 : vector<8x8xf32>
    %22 = arith.subf %21, %20 : vector<8x8xf32>
    %c0_17 = arith.constant 0 : index
    %c0_18 = arith.constant 0 : index
    %c0_19 = arith.constant 0 : index
    %23 = vector.load %arg6[%c0_17, %c0_18, %c0_19] : memref<1x1x1xf32, #tpu.memory_space<vmem>>, vector<1x1x1xf32>
    %24 = arith.mulf %22, %22 : vector<8x8xf32>
    %25 = vector.shape_cast %24 : vector<8x8xf32> to vector<1x8x8xf32>
    %cst_20 = arith.constant dense<0.000000e+00> : vector<1xf32>
    %26 = vector.multi_reduction <add>, %25, %cst_20 [1, 2] : vector<1x8x8xf32> to vector<1xf32>
    %27 = vector.shape_cast %26 : vector<1xf32> to vector<1x1x1xf32>
    %28 = vector.extract %27[0, 0, 0] : f32 from vector<1x1x1xf32>
    %29 = vector.broadcast %28 : f32 to vector<1x1x1xf32>
    %30 = arith.addf %23, %29 : vector<1x1x1xf32>
    %c0_21 = arith.constant 0 : index
    %c0_22 = arith.constant 0 : index
    %c0_23 = arith.constant 0 : index
    %31 = vector.load %arg6[%c0_21, %c0_22, %c0_23] : memref<1x1x1xf32, #tpu.memory_space<vmem>>, vector<1x1x1xf32>
    tpu.vector_store %arg6[%c0_21, %c0_22, %c0_23], %30 {strides = array<i32>} : memref<1x1x1xf32, #tpu.memory_space<vmem>>, vector<1x1x1xf32>,
    %cst_24 = arith.constant 1.000000e+00 : f32
    %32 = vector.broadcast %cst_24 : f32 to vector<8x8xf32>
    %33 = arith.subf %9, %32 : vector<8x8xf32>
    %cst_25 = arith.constant 1.000000e+04 : f32
    %34 = vector.broadcast %cst_25 : f32 to vector<8x8xf32>
    %35 = arith.mulf %33, %34 : vector<8x8xf32>
    %36 = arith.addf %20, %35 : vector<8x8xf32>
    %cst_26 = arith.constant dense<0xFF800000> : vector<8xf32>
    %37 = vector.multi_reduction <maximumf>, %36, %cst_26 [1] : vector<8x8xf32> to vector<8xf32>
    %38 = vector.shape_cast %37 : vector<8xf32> to vector<8x1xf32>
    %39 = vector.broadcast %38 : vector<8x1xf32> to vector<8x8xf32>
    %40 = arith.subf %36, %39 : vector<8x8xf32>
    %41 = math.exp %40 : vector<8x8xf32>
    %cst_27 = arith.constant dense<0.000000e+00> : vector<8xf32>
    %42 = vector.multi_reduction <add>, %41, %cst_27 [1] : vector<8x8xf32> to vector<8xf32>
    %43 = vector.shape_cast %42 : vector<8xf32> to vector<8x1xf32>
    %44 = tpu.reciprocal %43 {approx = true} : vector<8x1xf32> -> vector<8x1xf32>
    %45 = vector.broadcast %44 : vector<8x1xf32> to vector<8x8xf32>
    %46 = arith.mulf %41, %45 : vector<8x8xf32>
    %47 = arith.mulf %46, %9 : vector<8x8xf32>
    %c0_28 = arith.constant 0 : index
    %c0_29 = arith.constant 0 : index
    %c0_30 = arith.constant 0 : index
    %48 = vector.load %arg7[%c0_28, %c0_29, %c0_30] : memref<1x1x8xf32, #tpu.memory_space<vmem>>, vector<1x1x8xf32>
    %cst_31 = arith.constant dense<0.000000e+00> : vector<8xf32>
    %49 = vector.multi_reduction <add>, %47, %cst_31 [0] : vector<8x8xf32> to vector<8xf32>
    %50 = vector.shape_cast %49 : vector<8xf32> to vector<1x8xf32>
    %51 = vector.shape_cast %50 : vector<1x8xf32> to vector<1x1x8xf32>
    %52 = arith.addf %48, %51 : vector<1x1x8xf32>
    %c0_32 = arith.constant 0 : index
    %c0_33 = arith.constant 0 : index
    %c0_34 = arith.constant 0 : index
    %53 = vector.load %arg7[%c0_32, %c0_33, %c0_34] : memref<1x1x8xf32, #tpu.memory_space<vmem>>, vector<1x1x8xf32>
    tpu.vector_store %arg7[%c0_32, %c0_33, %c0_34], %52 {strides = array<i32>} : memref<1x1x8xf32, #tpu.memory_space<vmem>>, vector<1x1x8xf32>,
    %54 = tpu.iota {dimensions = array<i32: 0>} : vector<8x8xi32>
    %55 = tpu.iota {dimensions = array<i32: 1>} : vector<8x8xi32>
    %56 = arith.cmpi ne, %54, %55 : vector<8x8xi32>
    %57 = arith.extui %56 : vector<8x8xi1> to vector<8x8xi32>
    %58 = arith.sitofp %57 : vector<8x8xi32> to vector<8x8xf32>
    %c0_35 = arith.constant 0 : index
    %c0_36 = arith.constant 0 : index
    %c0_37 = arith.constant 0 : index
    %59 = vector.load %arg8[%c0_35, %c0_36, %c0_37] : memref<1x8x8xf32, #tpu.memory_space<vmem>>, vector<1x8x8xf32>
    %60 = arith.mulf %47, %58 : vector<8x8xf32>
    %61 = vector.shape_cast %60 : vector<8x8xf32> to vector<1x8x8xf32>
    %62 = arith.addf %59, %61 : vector<1x8x8xf32>
    %c0_38 = arith.constant 0 : index
    %c0_39 = arith.constant 0 : index
    %c0_40 = arith.constant 0 : index
    %63 = vector.load %arg8[%c0_38, %c0_39, %c0_40] : memref<1x8x8xf32, #tpu.memory_space<vmem>>, vector<1x8x8xf32>
    tpu.vector_store %arg8[%c0_38, %c0_39, %c0_40], %62 {strides = array<i32>} : memref<1x8x8xf32, #tpu.memory_space<vmem>>, vector<1x8x8xf32>,
    return
  }
  func.func @transform_0(%arg0: i32, %arg1: i32) -> (i32, i32, i32, i32) {
    %c0_i32 = arith.constant 0 : i32
    %c0_i32_0 = arith.constant 0 : i32
    %c0_i32_1 = arith.constant 0 : i32
    return %arg0, %arg1, %c0_i32, %c0_i32_0 : i32, i32, i32, i32
  }
  func.func @transform_1(%arg0: i32, %arg1: i32) -> (i32, i32, i32, i32) {
    %c0_i32 = arith.constant 0 : i32
    %c0_i32_0 = arith.constant 0 : i32
    %c0_i32_1 = arith.constant 0 : i32
    return %arg0, %arg1, %c0_i32, %c0_i32_0 : i32, i32, i32, i32
  }
  func.func @transform_2(%arg0: i32, %arg1: i32) -> (i32, i32, i32) {
    %c0_i32 = arith.constant 0 : i32
    %c0_i32_0 = arith.constant 0 : i32
    %c0_i32_1 = arith.constant 0 : i32
    return %arg0, %c0_i32, %c0_i32_0 : i32, i32, i32
  }
  func.func @transform_3(%arg0: i32, %arg1: i32) -> (i32, i32, i32) {
    %c0_i32 = arith.constant 0 : i32
    %c0_i32_0 = arith.constant 0 : i32
    %c0_i32_1 = arith.constant 0 : i32
    return %arg0, %c0_i32, %c0_i32_0 : i32, i32, i32
  }
  func.func @transform_4(%arg0: i32, %arg1: i32) -> (i32, i32, i32) {
    %c0_i32 = arith.constant 0 : i32
    %c0_i32_0 = arith.constant 0 : i32
    %c0_i32_1 = arith.constant 0 : i32
    return %arg0, %c0_i32, %c0_i32_0 : i32, i32, i32
  }
  func.func @transform_5(%arg0: i32, %arg1: i32) -> (i32, i32, i32) {
    %c0_i32 = arith.constant 0 : i32
    %c0_i32_0 = arith.constant 0 : i32
    %c0_i32_1 = arith.constant 0 : i32
    return %arg0, %c0_i32, %c0_i32_0 : i32, i32, i32
  }
  func.func @transform_6(%arg0: i32, %arg1: i32) -> (i32, i32, i32) {
    %c0_i32 = arith.constant 0 : i32
    %c0_i32_0 = arith.constant 0 : i32
    %c0_i32_1 = arith.constant 0 : i32
    return %arg0, %c0_i32, %c0_i32_0 : i32, i32, i32
  }
}

module attributes {stable_mosaic.version = 11 : i64} {
  func.func @_triplet_kernel(%arg0: i32, %arg1: memref<1x4x4x32xf32, #tpu.memory_space<vmem>>, %arg2: memref<1x4x4x32xf32, #tpu.memory_space<vmem>>, %arg3: memref<1x4x4xf32, #tpu.memory_space<vmem>>, %arg4: memref<1x1x1xf32, #tpu.memory_space<vmem>>, %arg5: memref<1x1x1xf32, #tpu.memory_space<vmem>>) attributes {dimension_semantics = [#tpu.dimension_semantics<parallel>], iteration_bounds = array<i64: 2>, scalar_prefetch = 0 : i64, scratch_operands = 0 : i64, tpu.core_type = #tpu.core_type<tc>, window_params = [{transform_indices = @transform_0, window_bounds = array<i64: 1, 4, 4, 32>}, {transform_indices = @transform_1, window_bounds = array<i64: 1, 4, 4, 32>}, {transform_indices = @transform_2, window_bounds = array<i64: 1, 4, 4>}, {transform_indices = @transform_3, window_bounds = array<i64: 1, 1, 1>}, {transform_indices = @transform_4, window_bounds = array<i64: 1, 1, 1>}]} {
    %c0 = arith.constant 0 : index
    %c0_0 = arith.constant 0 : index
    %c0_1 = arith.constant 0 : index
    %c0_2 = arith.constant 0 : index
    %0 = vector.load %arg1[%c0, %c0_0, %c0_1, %c0_2] : memref<1x4x4x32xf32, #tpu.memory_space<vmem>>, vector<1x4x4x32xf32>
    %1 = vector.shape_cast %0 : vector<1x4x4x32xf32> to vector<4x4x32xf32>
    %c0_3 = arith.constant 0 : index
    %c0_4 = arith.constant 0 : index
    %c0_5 = arith.constant 0 : index
    %c0_6 = arith.constant 0 : index
    %2 = vector.load %arg2[%c0_3, %c0_4, %c0_5, %c0_6] : memref<1x4x4x32xf32, #tpu.memory_space<vmem>>, vector<1x4x4x32xf32>
    %3 = vector.shape_cast %2 : vector<1x4x4x32xf32> to vector<4x4x32xf32>
    %c0_7 = arith.constant 0 : index
    %c0_8 = arith.constant 0 : index
    %c0_9 = arith.constant 0 : index
    %4 = vector.load %arg3[%c0_7, %c0_8, %c0_9] : memref<1x4x4xf32, #tpu.memory_space<vmem>>, vector<1x4x4xf32>
    %5 = vector.shape_cast %4 : vector<1x4x4xf32> to vector<4x4xf32>
    %6 = tpu.iota {dimensions = array<i32: 0>} : vector<4x4xi32>
    %7 = tpu.iota {dimensions = array<i32: 1>} : vector<4x4xi32>
    %8 = arith.cmpi ne, %6, %7 : vector<4x4xi32>
    %9 = arith.extui %8 : vector<4x4xi1> to vector<4x4xi32>
    %10 = arith.sitofp %9 : vector<4x4xi32> to vector<4x4xf32>
    %11 = vector.shape_cast %5 : vector<4x4xf32> to vector<4x4x1xf32>
    %12 = vector.shape_cast %5 : vector<4x4xf32> to vector<4x1x4xf32>
    %13 = vector.broadcast %11 : vector<4x4x1xf32> to vector<4x4x4xf32>
    %14 = vector.broadcast %12 : vector<4x1x4xf32> to vector<4x4x4xf32>
    %15 = arith.mulf %13, %14 : vector<4x4x4xf32>
    %cst = arith.constant 4.000000e+00 : f32
    %16 = vector.broadcast %cst : f32 to vector<4x4x4xf32>
    %17 = arith.cmpf oeq, %15, %16 : vector<4x4x4xf32>
    %18 = arith.extui %17 : vector<4x4x4xi1> to vector<4x4x4xi32>
    %19 = arith.sitofp %18 : vector<4x4x4xi32> to vector<4x4x4xf32>
    %20 = arith.mulf %1, %1 : vector<4x4x32xf32>
    %cst_10 = arith.constant dense<0.000000e+00> : vector<4x4xf32>
    %21 = vector.multi_reduction <add>, %20, %cst_10 [2] : vector<4x4x32xf32> to vector<4x4xf32>
    %22 = vector.shape_cast %21 : vector<4x4xf32> to vector<4x4x1xf32>
    %cst_11 = arith.constant 1.000000e-24 : f32
    %23 = vector.broadcast %cst_11 : f32 to vector<4x4x1xf32>
    %24 = arith.maximumf %22, %23 : vector<4x4x1xf32>
    %25 = math.rsqrt %24 : vector<4x4x1xf32>
    %26 = vector.broadcast %25 : vector<4x4x1xf32> to vector<4x4x32xf32>
    %27 = arith.mulf %1, %26 : vector<4x4x32xf32>
    "tpu.trace_start"() <{level = 10 : i32, message = "ijd,ikd->ijk"}> : () -> ()
    %cst_12 = arith.constant dense<0.000000e+00> : vector<4x4x4xf32>
    %28 = tpu.matmul %27, %27, %cst_12 {dimension_numbers = #tpu.dot_dimension_numbers<[2], [2], [1], [1], [0, 0, 0, 1, 1, 1], [0], [0]>} : vector<4x4x32xf32>, vector<4x4x32xf32>, vector<4x4x4xf32> -> vector<4x4x4xf32>
    %cst_13 = arith.constant 0.000000e+00 : f32
    "tpu.trace_stop"() : () -> ()
    %29 = vector.broadcast %cst_13 : f32 to vector<4x4x4xf32>
    %30 = arith.cmpf one, %28, %29 : vector<4x4x4xf32>
    %31 = arith.extui %30 : vector<4x4x4xi1> to vector<4x4x4xi32>
    %32 = arith.sitofp %31 : vector<4x4x4xi32> to vector<4x4x4xf32>
    %33 = vector.shape_cast %10 : vector<4x4xf32> to vector<1x4x4xf32>
    %34 = vector.broadcast %33 : vector<1x4x4xf32> to vector<4x4x4xf32>
    %35 = arith.mulf %32, %34 : vector<4x4x4xf32>
    %36 = arith.mulf %19, %35 : vector<4x4x4xf32>
    %37 = arith.mulf %28, %36 : vector<4x4x4xf32>
    %38 = arith.mulf %3, %3 : vector<4x4x32xf32>
    %cst_14 = arith.constant dense<0.000000e+00> : vector<4x4xf32>
    %39 = vector.multi_reduction <add>, %38, %cst_14 [2] : vector<4x4x32xf32> to vector<4x4xf32>
    %40 = vector.shape_cast %39 : vector<4x4xf32> to vector<4x4x1xf32>
    %cst_15 = arith.constant 1.000000e-24 : f32
    %41 = vector.broadcast %cst_15 : f32 to vector<4x4x1xf32>
    %42 = arith.maximumf %40, %41 : vector<4x4x1xf32>
    %43 = math.rsqrt %42 : vector<4x4x1xf32>
    %44 = vector.broadcast %43 : vector<4x4x1xf32> to vector<4x4x32xf32>
    %45 = arith.mulf %3, %44 : vector<4x4x32xf32>
    "tpu.trace_start"() <{level = 10 : i32, message = "ijd,ikd->ijk"}> : () -> ()
    %cst_16 = arith.constant dense<0.000000e+00> : vector<4x4x4xf32>
    %46 = tpu.matmul %45, %45, %cst_16 {dimension_numbers = #tpu.dot_dimension_numbers<[2], [2], [1], [1], [0, 0, 0, 1, 1, 1], [0], [0]>} : vector<4x4x32xf32>, vector<4x4x32xf32>, vector<4x4x4xf32> -> vector<4x4x4xf32>
    %cst_17 = arith.constant 0.000000e+00 : f32
    "tpu.trace_stop"() : () -> ()
    %47 = vector.broadcast %cst_17 : f32 to vector<4x4x4xf32>
    %48 = arith.cmpf one, %46, %47 : vector<4x4x4xf32>
    %49 = arith.extui %48 : vector<4x4x4xi1> to vector<4x4x4xi32>
    %50 = arith.sitofp %49 : vector<4x4x4xi32> to vector<4x4x4xf32>
    %51 = vector.shape_cast %10 : vector<4x4xf32> to vector<1x4x4xf32>
    %52 = vector.broadcast %51 : vector<1x4x4xf32> to vector<4x4x4xf32>
    %53 = arith.mulf %50, %52 : vector<4x4x4xf32>
    %54 = arith.mulf %19, %53 : vector<4x4x4xf32>
    %55 = arith.mulf %46, %54 : vector<4x4x4xf32>
    %56 = arith.subf %55, %37 : vector<4x4x4xf32>
    %57 = math.absf %56 : vector<4x4x4xf32>
    %cst_18 = arith.constant 1.000000e+00 : f32
    %58 = vector.broadcast %cst_18 : f32 to vector<4x4x4xf32>
    %59 = arith.cmpf olt, %57, %58 : vector<4x4x4xf32>
    %cst_19 = arith.constant 5.000000e-01 : f32
    %60 = vector.broadcast %cst_19 : f32 to vector<4x4x4xf32>
    %61 = arith.mulf %60, %56 : vector<4x4x4xf32>
    %62 = arith.mulf %61, %56 : vector<4x4x4xf32>
    %cst_20 = arith.constant 5.000000e-01 : f32
    %63 = vector.broadcast %cst_20 : f32 to vector<4x4x4xf32>
    %64 = arith.subf %57, %63 : vector<4x4x4xf32>
    %65 = arith.select %59, %62, %64 : vector<4x4x4xi1>, vector<4x4x4xf32>
    %66 = vector.shape_cast %65 : vector<4x4x4xf32> to vector<1x4x4x4xf32>
    %cst_21 = arith.constant dense<0.000000e+00> : vector<1xf32>
    %67 = vector.multi_reduction <add>, %66, %cst_21 [1, 2, 3] : vector<1x4x4x4xf32> to vector<1xf32>
    %68 = vector.shape_cast %67 : vector<1xf32> to vector<1x1x1x1xf32>
    %69 = vector.extract %68[0, 0, 0, 0] : f32 from vector<1x1x1x1xf32>
    %70 = vector.broadcast %69 : f32 to vector<1x1x1xf32>
    %c0_22 = arith.constant 0 : index
    %c0_23 = arith.constant 0 : index
    %c0_24 = arith.constant 0 : index
    %71 = vector.load %arg4[%c0_22, %c0_23, %c0_24] : memref<1x1x1xf32, #tpu.memory_space<vmem>>, vector<1x1x1xf32>
    tpu.vector_store %arg4[%c0_22, %c0_23, %c0_24], %70 {strides = array<i32>} : memref<1x1x1xf32, #tpu.memory_space<vmem>>, vector<1x1x1xf32>,
    %72 = vector.shape_cast %54 : vector<4x4x4xf32> to vector<1x4x4x4xf32>
    %cst_25 = arith.constant dense<0.000000e+00> : vector<1xf32>
    %73 = vector.multi_reduction <add>, %72, %cst_25 [1, 2, 3] : vector<1x4x4x4xf32> to vector<1xf32>
    %74 = vector.shape_cast %73 : vector<1xf32> to vector<1x1x1x1xf32>
    %75 = vector.extract %74[0, 0, 0, 0] : f32 from vector<1x1x1x1xf32>
    %76 = vector.broadcast %75 : f32 to vector<1x1x1xf32>
    %c0_26 = arith.constant 0 : index
    %c0_27 = arith.constant 0 : index
    %c0_28 = arith.constant 0 : index
    %77 = vector.load %arg5[%c0_26, %c0_27, %c0_28] : memref<1x1x1xf32, #tpu.memory_space<vmem>>, vector<1x1x1xf32>
    tpu.vector_store %arg5[%c0_26, %c0_27, %c0_28], %76 {strides = array<i32>} : memref<1x1x1xf32, #tpu.memory_space<vmem>>, vector<1x1x1xf32>,
    return
  }
  func.func @transform_0(%arg0: i32) -> (i32, i32, i32, i32) {
    %c0_i32 = arith.constant 0 : i32
    %c0_i32_0 = arith.constant 0 : i32
    %c0_i32_1 = arith.constant 0 : i32
    %c0_i32_2 = arith.constant 0 : i32
    return %arg0, %c0_i32, %c0_i32_0, %c0_i32_1 : i32, i32, i32, i32
  }
  func.func @transform_1(%arg0: i32) -> (i32, i32, i32, i32) {
    %c0_i32 = arith.constant 0 : i32
    %c0_i32_0 = arith.constant 0 : i32
    %c0_i32_1 = arith.constant 0 : i32
    %c0_i32_2 = arith.constant 0 : i32
    return %arg0, %c0_i32, %c0_i32_0, %c0_i32_1 : i32, i32, i32, i32
  }
  func.func @transform_2(%arg0: i32) -> (i32, i32, i32) {
    %c0_i32 = arith.constant 0 : i32
    %c0_i32_0 = arith.constant 0 : i32
    %c0_i32_1 = arith.constant 0 : i32
    return %arg0, %c0_i32, %c0_i32_0 : i32, i32, i32
  }
  func.func @transform_3(%arg0: i32) -> (i32, i32, i32) {
    %c0_i32 = arith.constant 0 : i32
    %c0_i32_0 = arith.constant 0 : i32
    %c0_i32_1 = arith.constant 0 : i32
    return %arg0, %c0_i32, %c0_i32_0 : i32, i32, i32
  }
  func.func @transform_4(%arg0: i32) -> (i32, i32, i32) {
    %c0_i32 = arith.constant 0 : i32
    %c0_i32_0 = arith.constant 0 : i32
    %c0_i32_1 = arith.constant 0 : i32
    return %arg0, %c0_i32, %c0_i32_0 : i32, i32, i32
  }
}

</mosaic_0001>

<bundles_post_ra>
// kernel: token_phrase_loss.2
= control target key start
LH: loop header
LB: loop body
LE: loop exit
PB: predicated region body
PF: predicated region fallthrough
CT: control target
= control target key end

     0   :  { %s848_s21 = smov 0   ;;  %s850_s22 = smov 0   ;;  %s960_s0 = inlined_call_operand.vmem [shape: bf16[2,4,8,8], index: 0, kind: input, shape index: {}]   ;;  %s961_s1 = inlined_call_operand.vmem [shape: bf16[2,4,8,8], index: 1, kind: input, shape index: {}]   ;;  %s962_s2 = inlined_call_operand.vmem [shape: f32[2,1,8], index: 2, kind: input, shape index: {}]   ;;  %s963_s3 = inlined_call_operand.vmem [shape: f32[2,8,1], index: 3, kind: input, shape index: {}]   ;;  %s964_s4 = inlined_call_operand.vmem [shape: f32[2,1,1], index: 4, kind: output, shape index: {0}]   ;;  %s965_s5 = inlined_call_operand.vmem [shape: f32[2,1,8], index: 5, kind: output, shape index: {1}]   ;;  %s966_s6 = inlined_call_operand.vmem [shape: f32[2,8,8], index: 6, kind: output, shape index: {2}]  }
   0x1   :  { %s852_s23 = smov 0   ;;  %s854_s24 = smov 0  }
   0x2   :  { %s856_s25 = smov 0  }
   0x3 LB: > { %s26_s26 = sadd.s32 1, %s799_s23  ;;  %s29_s27 = sadd.s32 1, %s803_s24  ;;  %s807_s25 = sphi %s856_s25, %s17_s25   ;;  %s803_s24 = sphi %s854_s24, %s974_s24   ;;  %s799_s23 = sphi %s852_s23, %s973_s23   ;;  %s795_s22 = sphi %s850_s22, %s972_s22   ;;  %s791_s21 = sphi %s848_s21, %s971_s21  }
   0x4   : > { %p27_p0 = scmp.ge.s32.totalorder %s26_s26, 4  ;;  %p687_p1 = scmp.ge.s32.totalorder %s807_s25, 1 }
   0x5   : > { %p266_p2 = scmp.lt.s32.totalorder %s807_s25, 9 }
   0x6   : > { %s976_s26 = smov (%p27_p0, %s26_s26), 0  ;;  %s978_s27 = smov (!%p27_p0, %s29_s27), %s803_s24 }
   0x7   : > { %967 = sst [smem:[#allocation2_spill]] %s976_s26  ;;  %p267_p3 = pnand %p687_p1, %p266_p2 }
   0x8   : > { %p31_p4 = scmp.ge.s32.totalorder %s978_s27, 2  ;;  %p319_p5 = scmp.lt.s32.totalorder (!%p267_p3), %s795_s22, 1 }
   0x9   : > { %270 = sbr.rel (%p267_p3) target bundleno = 589 (0x24d), region = 36  ;;  %p321_p6 = scmp.lt.s32.totalorder (!%p267_p3), %s791_s21, 3 }
   0xa   : > { %s980_s27 = smov (%p31_p4, %s978_s27), 0  ;;  %p694_p7 = scmp.ne.s32.totalorder (!%p267_p3), %s791_s21, 0 }
   0xb   : > { %968 = sst [smem:[#allocation3_spill]] %s980_s27 }
  0x10   : > { %s982_s22 = smov (!%p319_p5, %s795_s22), 1  ;;  %vm357_vm0 = vcmask (!%p694_p7), 0   ;;  %vm359_vm1 = vcmask (!%p694_p7), 57344   ;;  %vm361_vm2 = vcmask (!%p694_p7), 64512   ;;  %v809_v0 = vmov (!%p694_p7), 0.0  }
  0x11   : > { %s322_s28 = scalar_select %p321_p6, %s791_s21, 3 }
  0x12   : > { %s688_s29 = sshll.u32 %s982_s22, 2  ;;  %s337_s8 = scalar_lea.vmem %s962_s2, %s982_s22 }
  0x13   : > { %s324_s9 = sadd.s32 %s688_s29, %s322_s28  ;;  %s692_s10 = sshll.u32 %s982_s22, 3 }
  0x14   : > { %s689_s11 = sshll.u32 %s324_s9, 2  ;;  %s341_s14 = scalar_lea.vmem %s963_s3, %s692_s10 }
  0x15   : > { %s326_s17 = scalar_lea.vmem %s960_s0, %s689_s11  ;;  %s334_s20 = scalar_lea.vmem %s961_s1, %s689_s11 }
  0x16   : > { %s903_s30 = scalar_lea.vmem %s964_s4, %s982_s22  ;;  %s909_s7 = scalar_lea.vmem %s965_s5, %s982_s22 }
  0x17   : > { %s914_s13 = scalar_lea.vmem %s966_s6, %s692_s10  ;;  %356 = sbr.rel (%p694_p7) target bundleno = 30 (0x1e), region = 40  ;;  %358 = vst.msk [vmem:[%s903_s30] sm:$0x1] (!%p694_p7), %vm357_vm0, %v809_v0 }
  0x18   : > { %360 = vst.msk [vmem:[%s909_s7] sm:$0x1] (!%p694_p7), %vm359_vm1, %v809_v0 }
  0x19   : > { %362 = vst.msk [vmem:[%s914_s13] sm:$0xff] (!%p694_p7), %vm361_vm2, %v809_v0 }
  0x1e PF: > { %v377_v1 = vld [vmem:[%s326_s17] sm:$0xf]  ;;  %vm379_vm3 = vcmask 64512   ;;  %v810_v3 = vmov 0.0   ;;  %vm811_vm4 = vmmov 0   ;;  %v812_v7 = vmov 0  }
  0x1f   : > { %v378_v2 = vld [vmem:[%s334_s20] sm:$0xf]  ;;  %706 = vmatprep.subr.bf16.mxu0 %v810_v3  ;;  %712 = vmatprep.subr.bf16.mxu1 %v810_v3  ;;  %v381_v4 = vsel %vm379_vm3, %v377_v1, 0  ;;  %vm485_vm5 = vcmask 0   ;;  %v513_v46 = vlaneseq  ;;  %vm511_vm7 = vcmask 57344  }
  0x20   : > { %v425_v5 = vsel %vm379_vm3, %v378_v2, 0  ;;  %707 = vmatpush3.bf16.xpose.msra.mxu0 %v381_v4  ;;  %v364_v6 = vld [vmem:[%s341_s14] sm:$0xff]  ;;  %708 = vmatprep.mubr.msk.bf16.mxu0 %vm811_vm4, %v810_v3 }
  0x21   : > { %713 = vmatpush3.bf16.xpose.msra.mxu1 %v425_v5  ;;  %714 = vmatprep.mubr.msk.bf16.mxu1 %vm811_vm4, %v810_v3  ;;  %v695_v9 = vld [vmem:[%s337_s8] ss:$0 sm:$0xff]  ;;  %v514_v47 = vshrl.u32 %v513_v46, 7  ;;  %v516_v48 = vand.u32 127, %v513_v46 }
  0x22   : > { %764 = vset.pattern.permute.xlu0 %v812_v7  ;;  %v471_v42 = vld [vmem:[%s903_s30] sm:$0x1] }
  0x23   : > { %367 = vperm.xlu0 %764, %v364_v6   ;;  %vm517_vm6 = vcmp.ne.s32.totalorder %v514_v47, %v516_v48  ;;  %v520_v53 = vld [vmem:[%s914_s13] sm:$0xff] }
  0x24   : > { %v699_v51 = vsel %vm517_vm6, 1.0, %v810_v3  ;;  %v502_v62 = vld [vmem:[%s909_s7] sm:$0x1] }
  0x27   : > { %709 = vmatmul.mubr.msk.bf16.vlgmr.msra.gmra.mrb[0].mxu0 %vm379_vm3, %v377_v1 }
  0x28   : > { %715 = vmatmul.mubr.msk.bf16.vlgmr.msra.gmra.mrb[0].mxu1 %vm379_vm3, %v378_v2 }
  0xa2   : > { %v368_v8 = vpop.permute.xlu0 %367 }
  0xa3   : > { %v376_v10 = vmul.f32 %v695_v9, %v368_v8 }
  0xa5   : > { %v698_v11 = vadd.f32 -1.0, %v376_v10 }
  0xa7   : > { %v488_v14 = vmul.f32 10000.0, %v698_v11 }
  0xfa   : > { %v417_v12 = vpop.f32.mrb[0].mxu0 }
  0xfb   : > { %v461_v13 = vpop.f32.mrb[0].mxu1  ;;  %v423_v15 = vmul.f32 0.35355338, %v417_v12  ;;  %v710_v17 = vpop.f32.mrb[1].mxu0 }
  0xfc   : > { %v467_v16 = vmul.f32 0.35355338, %v461_v13  ;;  %v716_v18 = vpop.f32.mrb[1].mxu1  ;;  %v420_v19 = vpop.f32.mrb[2].mxu0 }
  0xfd   : > { %v464_v20 = vpop.f32.mrb[2].mxu1  ;;  %v468_v21 = vmul.f32 %v423_v15, %v376_v10  ;;  %v711_v23 = vpop.f32.mrb[3].mxu0 }
  0xfe   : > { %v469_v22 = vmul.f32 %v467_v16, %v376_v10  ;;  %v717_v24 = vpop.f32.mrb[3].mxu1 }
  0xff   : > { %v489_v25 = vadd.f32 %v488_v14, %v468_v21 }
 0x100   : > { %v470_v26 = vsub.f32 %v469_v22, %v468_v21 }
 0x101   : > { %v490_v27 = vsel %vm379_vm3, %v489_v25, -inf }
 0x102   : > { %v472_v28 = vmul.f32 %v470_v26, %v470_v26  ;;  %491 = vmax.xlane.f32.xlu0 %v490_v27 }
 0x104   : > { %v473_v29 = vsel %vm379_vm3, %v472_v28, 0.0 }
 0x105   : > { %474 = vadd.xlane.f32.xlu1 %v473_v29 }
 0x18f   : > { %v492_v30 = vpop.xlane.xlu0 %491 }
 0x190   : > { %v493_v31 = vsub.f32 %v489_v25, %v492_v30 }
 0x192   : > { %v475_v32 = vpop.xlane.xlu1 %474  ;;  %v494_v33 = vmul.f32 1.442695, %v493_v31 }
 0x193   : > { %v476_v34 = vrot.slane %v475_v32, 4 }
 0x194   : > { %765 = vpow2.f32 %v494_v33 }
 0x195   : > { %v477_v35 = vadd.f32 %v476_v34, %v475_v32 }
 0x197   : > { %v478_v36 = vrot.slane %v477_v35, 2 }
 0x199   : > { %v479_v37 = vadd.f32 %v478_v36, %v477_v35 }
 0x19b   : > { %v480_v38 = vrot.slane %v479_v37, 1 }
 0x19d   : > { %v481_v39 = vadd.f32 %v480_v38, %v479_v37 }
 0x19e   : > { %v766_v40 = vpop.eup %765 }
 0x19f   : > { %718 = vpush %v481_v39  ;;  %v496_v41 = vsel %vm379_vm3, %v766_v40, 0.0 }
 0x1a0   : > { %497 = vadd.xlane.f32.xlu1 %v496_v41 }
 0x1d0   : > { %s719_s22 = spop %718 }
 0x1d1   : > { %v483_v43 = vstv %s719_s22 }
 0x1d2   : > { %v484_v44 = vadd.f32 %v483_v43, %v471_v42 }
 0x1d4   : > { %486 = vst.msk [vmem:[%s903_s30] sm:$0x1] %vm485_vm5, %v484_v44 }
 0x22d   : > { %v498_v45 = vpop.xlane.xlu1 %497 }
 0x22e   : > { %767 = vrcp.f32 %v498_v45 }
 0x238   : > { %v768_v49 = vpop.eup %767 }
 0x239   : > { %v500_v50 = vmul.f32 %v768_v49, %v766_v40 }
 0x23b   : > { %v501_v52 = vmul.f32 %v500_v50, %v376_v10 }
 0x23d   : > { %v503_v54 = vsel %vm379_vm3, %v501_v52, 0.0  ;;  %v521_v55 = vmul.f32 %v699_v51, %v501_v52 }
 0x23e   : > { %v504_v56 = vrot.slane %v503_v54, 4 }
 0x23f   : > { %v522_v57 = vadd.f32 %v521_v55, %v520_v53 }
 0x240   : > { %v505_v58 = vadd.f32 %v504_v56, %v503_v54 }
 0x241   : > { %523 = vst.msk [vmem:[%s914_s13] sm:$0xff] %vm379_vm3, %v522_v57 }
 0x242   : > { %v506_v59 = vrot.slane %v505_v58, 2 }
 0x244   : > { %v507_v60 = vadd.f32 %v506_v59, %v505_v58 }
 0x246   : > { %v508_v61 = vrot.slane %v507_v60, 1 }
 0x248   : > { %v509_v63 = vadd.f32 %v508_v61, %v507_v60 }
 0x24a   : > { %v510_v0 = vadd.f32 %v509_v63, %v502_v62 }
 0x24c   : > { %512 = vst.msk [vmem:[%s909_s7] sm:$0x1] %vm511_vm7, %v510_v0 }
 0x24d PF: > { %s17_s25 = sadd.s32 1, %s807_s25   ;;  %s969_s27 = sld [smem:[#allocation2_spill]] }
 0x24e   : > { %p14_p8 = scmp.ge.s32.totalorder %s17_s25, 10   ;;  %s970_s8 = sld [smem:[#allocation3_spill]] }
 0x24f   : > { %s971_s21 = smov %s799_s23  ;;  %s972_s22 = smov %s803_s24 }
 0x250   :  { %16 = sbr.rel (!%p14_p8) target bundleno = 3 (0x3), region = 103 }
 0x253   : > { %s973_s23 = smov %s969_s27 }
 0x254   : > { %s974_s24 = smov %s970_s8 }

// kernel: token_phrase_loss.3
= control target key start
LH: loop header
LB: loop body
LE: loop exit
PB: predicated region body
PF: predicated region fallthrough
CT: control target
= control target key end

     0   :  { %s1367_s15 = smov 0   ;;  %s1560_s0 = inlined_call_operand.vmem [shape: f32[2,4,4,32], index: 0, kind: input, shape index: {}]   ;;  %s1561_s1 = inlined_call_operand.vmem [shape: f32[2,4,4,32], index: 1, kind: input, shape index: {}]   ;;  %s1562_s2 = inlined_call_operand.vmem [shape: f32[2,4,4], index: 2, kind: input, shape index: {}]   ;;  %s1563_s3 = inlined_call_operand.vmem [shape: f32[2,1,1], index: 3, kind: output, shape index: {0}]   ;;  %s1564_s4 = inlined_call_operand.vmem [shape: f32[2,1,1], index: 4, kind: output, shape index: {1}]  }
   0x1 LB: > { %s1197_s16 = sadd.s32 4294967295, %s1337_s15   ;;  %p1201_p0 = scmp.ge.s32.totalorder %s1337_s15, 1  ;;  %s1337_s15 = sphi %s1367_s15, %s15_s15  }
   0x2   : > { %p184_p1 = scmp.lt.s32.totalorder %s1337_s15, 3 }
   0x4   : > { %p185_p2 = pnand %p1201_p0, %p184_p1 }
   0x5   : > { %p220_p3 = scmp.lt.s32.totalorder (!%p185_p2), %s1197_s16, 1  ;;  %vm349_vm0 = vcmask (!%p185_p2), 257024   ;;  %v1339_v24 = vmov (!%p185_p2), 0.0   ;;  %vm1340_vm1 = vmmov (!%p185_p2), 0   ;;  %v249_v25 = vlaneseq (!%p185_p2) }
   0x6   : > { %188 = sbr.rel (%p185_p2) target bundleno = 634 (0x27a), region = 32  ;;  %1260 = vmatprep.subr.mxu0 (!%p185_p2), %v1339_v24  ;;  %1265 = vmatprep.subr.mxu1 (!%p185_p2), %v1339_v24  ;;  %v1341_v26 = vmov (!%p185_p2), 1966171168   ;;  %vm374_vm3 = vcmask (!%p185_p2), 261120   ;;  %vm1063_vm15 = vcmask (!%p185_p2), 27648  }
   0x7   : > { %1262 = vmatprep.mubr.msk.f32.mxu0 (!%p185_p2), %vm1340_vm1, %v1339_v24  ;;  %1267 = vmatprep.mubr.msk.f32.mxu1 (!%p185_p2), %vm1340_vm1, %v1339_v24  ;;  %v286_v27 = vunpack.c.l.s4 (!%p185_p2), %v1341_v26  ;;  %v1434_v28 = vshrl.u32 (!%p185_p2), %v249_v25, 7  ;;  %v1436_v29 = vand.u32 (!%p185_p2), 127, %v249_v25 }
   0x9   : > { %v287_v31 = vunpack.c.0.s8 (!%p185_p2), %v286_v27  ;;  %v265_v32 = vsub.s32 (!%p185_p2), 1, %v1434_v28  ;;  %v1440_v33 = vsub.s32 (!%p185_p2), 0, %v1434_v28  ;;  %v272_v34 = vsub.s32 (!%p185_p2), 2, %v1434_v28 }
   0xa   : > { %vm253_vm2 = vcmp.ne.s32.totalorder (!%p185_p2), %v1434_v28, %v1436_v29  ;;  %v279_v40 = vsub.s32 (!%p185_p2), 3, %v1434_v28 }
   0xb   : > { %v1444_v35 = vsub.s32 (!%p185_p2), %v287_v31, %v1434_v28  ;;  %v1513_v26 = vsel (!%p185_p2), %vm253_vm2, 1.0, %v1339_v24 }
   0xd   : > { %s1568_s16 = smov (!%p220_p3, %s1197_s16), 1 }
   0xe   : > { %s1242_s17 = sshll.u32 %s1568_s16, 4  ;;  %s1206_s24 = sshll.u32 %s1568_s16, 2 }
   0xf   : > { %s224_s20 = scalar_lea.vmem %s1560_s0, %s1242_s17  ;;  %s229_s23 = scalar_lea.vmem %s1561_s1, %s1242_s17 }
  0x10   : > { %v1384_v0 = vld [vmem:[%s224_s20] sm:$0xf]  ;;  %v1386_v1 = vld [vmem:[%s224_s20 + $0x8] sm:$0xf]  ;;  %v1388_v2 = vld [vmem:[%s224_s20 + $0x4] sm:$0xf]  ;;  %s233_s27 = scalar_lea.vmem %s1562_s2, %s1206_s24  ;;  %s236_s30 = scalar_lea.vmem %s1563_s3, %s1568_s16 }
  0x11   : > { %v345_v3 = vmul.f32 %v1384_v0, %v1384_v0  ;;  %v347_v4 = vmul.f32 %v1386_v1, %v1386_v1  ;;  %v346_v5 = vmul.f32 %v1388_v2, %v1388_v2  ;;  %v1396_v6 = vld [vmem:[%s224_s20 + $0xc] sm:$0xf]  ;;  %v1400_v8 = vld [vmem:[%s229_s23] sm:$0xf]  ;;  %v1402_v9 = vld [vmem:[%s229_s23 + $0x4] sm:$0xf]  ;;  %s239_s8 = scalar_lea.vmem %s1564_s4, %s1568_s16 }
  0x12   : > { %v348_v7 = vmul.f32 %v1396_v6, %v1396_v6  ;;  %v691_v14 = vmul.f32 %v1400_v8, %v1400_v8  ;;  %v692_v15 = vmul.f32 %v1402_v9, %v1402_v9  ;;  %v1412_v16 = vld [vmem:[%s229_s23 + $0x8] sm:$0xf]  ;;  %v1414_v17 = vld [vmem:[%s229_s23 + $0xc] sm:$0xf]  ;;  %v248_v30 = vld [vmem:[%s233_s27] sm:$0xf] }
  0x13   : > { %v350_v10 = vsel %vm349_vm0, %v345_v3, 0.0  ;;  %v356_v11 = vsel %vm349_vm0, %v347_v4, 0.0  ;;  %v353_v12 = vsel %vm349_vm0, %v346_v5, 0.0  ;;  %v693_v20 = vmul.f32 %v1412_v16, %v1412_v16 }
  0x14   : > { %351 = vadd.xlane.f32.xlu0 %v350_v10  ;;  %357 = vadd.xlane.f32.xlu1 %v356_v11  ;;  %v359_v13 = vsel %vm349_vm0, %v348_v7, 0.0  ;;  %v695_v18 = vsel %vm349_vm0, %v691_v14, 0.0  ;;  %v698_v19 = vsel %vm349_vm0, %v692_v15, 0.0  ;;  %v694_v21 = vmul.f32 %v1414_v17, %v1414_v17 }
  0x15   : > { %v701_v22 = vsel %vm349_vm0, %v693_v20, 0.0  ;;  %v266_v36 = vrot.slane %v248_v30, %v265_v32  ;;  %v259_v37 = vrot.slane %v248_v30, %v1440_v33  ;;  %v1450_v38 = vrot.slane %v248_v30, %v1444_v35 }
  0x16   : > { %v704_v23 = vsel %vm349_vm0, %v694_v21, 0.0  ;;  %v273_v39 = vrot.slane %v248_v30, %v272_v34  ;;  %v280_v43 = vrot.slane %v248_v30, %v279_v40 }
  0x17   : > { %v292_v41 = vcombine.high %v1450_v38, %v1450_v38 }
  0x18   : > { %354 = vadd.xlane.f32.xlu0 %v353_v12  ;;  %360 = vadd.xlane.f32.xlu1 %v359_v13  ;;  %v299_v12 = vrot.slane %v1450_v38, %v1444_v35 }
  0x19   : > { %v1456_v42 = vrot.slane %v292_v41, %v1444_v35 }
  0x1a   : > { %v312_v14 = vrot.slane %v299_v12, %v1440_v33  ;;  %v307_v15 = vcombine.high %v299_v12, %v299_v12 }
  0x1b   : > { %v308_v21 = vcombine.high %v1456_v42, %v1456_v42 }
  0x1c   : > { %696 = vadd.xlane.f32.xlu0 %v695_v18  ;;  %699 = vadd.xlane.f32.xlu1 %v698_v19  ;;  %v316_v18 = vrot.slane %v1456_v42, %v1440_v33  ;;  %v320_v20 = vrot.slane %v307_v15, %v1440_v33 }
  0x1d   : > { %v324_v25 = vrot.slane %v308_v21, %v1440_v33 }
  0x20   : > { %702 = vadd.xlane.f32.xlu0 %v701_v22  ;;  %705 = vadd.xlane.f32.xlu1 %v704_v23 }
  0x31   : > { %268 = vbcast.lane.b32.xlu1 %v266_v36, 256 }
  0x35   : > { %275 = vbcast.lane.b32.xlu1 %v273_v39, 256 }
  0x36   : > { %261 = vbcast.lane.b32.xlu0 %v259_v37, 256 }
  0x39   : > { %282 = vbcast.lane.b32.xlu1 %v280_v43, 256 }
  0xa1   : > { %v352_v44 = vpop.xlane.xlu0 %351  ;;  %v358_v45 = vpop.xlane.xlu1 %357 }
  0xa2   : > { %v362_v46 = vmax.f32 %v352_v44, 1e-24  ;;  %v364_v47 = vmax.f32 %v358_v45, 1e-24 }
  0xa4   : > { %1315 = vrsqrt.f32 %v362_v46 }
  0xa5   : > { %1317 = vrsqrt.f32 %v364_v47  ;;  %v355_v48 = vpop.xlane.xlu0 %354  ;;  %v361_v49 = vpop.xlane.xlu1 %360 }
  0xa6   : > { %v363_v50 = vmax.f32 %v355_v48, 1e-24  ;;  %v365_v51 = vmax.f32 %v361_v49, 1e-24 }
  0xa8   : > { %1319 = vrsqrt.f32 %v363_v50 }
  0xa9   : > { %1321 = vrsqrt.f32 %v365_v51  ;;  %v697_v52 = vpop.xlane.xlu0 %696  ;;  %v700_v53 = vpop.xlane.xlu1 %699 }
  0xaa   : > { %v707_v54 = vmax.f32 %v697_v52, 1e-24  ;;  %v708_v55 = vmax.f32 %v700_v53, 1e-24 }
  0xac   : > { %1323 = vrsqrt.f32 %v707_v54 }
  0xad   : > { %1325 = vrsqrt.f32 %v708_v55  ;;  %v703_v56 = vpop.xlane.xlu0 %702  ;;  %v706_v57 = vpop.xlane.xlu1 %705 }
  0xae   : > { %v1316_v58 = vpop.eup %1315  ;;  %v709_v59 = vmax.f32 %v703_v56, 1e-24  ;;  %v710_v60 = vmax.f32 %v706_v57, 1e-24 }
  0xaf   : > { %v1318_v61 = vpop.eup %1317  ;;  %v370_v62 = vmul.f32 %v1316_v58, %v1384_v0 }
  0xb0   : > { %1327 = vrsqrt.f32 %v709_v59  ;;  %v372_v63 = vmul.f32 %v1318_v61, %v1386_v1 }
  0xb1   : > { %1329 = vrsqrt.f32 %v710_v60  ;;  %1261 = vmatpush3.xpose.msk.msra.mxu0 %vm374_vm3, %v370_v62  ;;  %v269_v13 = vpop.permute.xlu1 %268 }
  0xb2   : > { %v1320_v3 = vpop.eup %1319  ;;  %1270 = vmatprep.subr.mxu0 %v1339_v24  ;;  %v330_v22 = vmul.f32 %v316_v18, %v269_v13 }
  0xb3   : > { %v1322_v4 = vpop.eup %1321  ;;  %v371_v5 = vmul.f32 %v1320_v3, %v1388_v2 }
  0xb4   : > { %1263 = vmatmul.mubr.msk.f32.vlgmr.msra.gmra.mrb[0].mxu0 %vm374_vm3, %v370_v62  ;;  %v373_v0 = vmul.f32 %v1322_v4, %v1396_v6  ;;  %vm334_vm6 = vcmp.eq.f32.partialorder %v330_v22, 4.0 }
  0xb5   : > { %1266 = vmatpush3.xpose.msk.msra.mxu1 %vm374_vm3, %v371_v5  ;;  %1271 = vmatpush3.xpose.msk.msra.mxu0 %vm374_vm3, %v372_v63  ;;  %v1209_v39 = vsel %vm334_vm6, 1.0, %v1339_v24 }
  0xb6   : > { %v1324_v7 = vpop.eup %1323  ;;  %1272 = vmatprep.mubr.msk.f32.mxu0 %vm1340_vm1, %v1339_v24  ;;  %1275 = vmatprep.subr.mxu1 %v1339_v24 }
  0xb7   : > { %v1326_v1 = vpop.eup %1325  ;;  %1280 = vmatprep.subr.mxu0 %v1339_v24  ;;  %v715_v10 = vmul.f32 %v1324_v7, %v1400_v8 }
  0xb8   : > { %1268 = vmatmul.mubr.msk.f32.vlgmr.msra.gmra.mrb[0].mxu1 %vm374_vm3, %v371_v5  ;;  %1273 = vmatmul.mubr.msk.f32.vlgmr.msra.gmra.mrb[2].mxu0 %vm374_vm3, %v372_v63  ;;  %v716_v2 = vmul.f32 %v1326_v1, %v1402_v9 }
  0xb9   : > { %1276 = vmatpush3.xpose.msk.msra.mxu1 %vm374_vm3, %v373_v0  ;;  %1281 = vmatpush3.xpose.msk.msra.mxu0 %vm374_vm3, %v715_v10 }
  0xba   : > { %v1328_v6 = vpop.eup %1327  ;;  %1277 = vmatprep.mubr.msk.f32.mxu1 %vm1340_vm1, %v1339_v24  ;;  %1282 = vmatprep.mubr.msk.f32.mxu0 %vm1340_vm1, %v1339_v24 }
  0xbb   : > { %v1330_v11 = vpop.eup %1329  ;;  %1285 = vmatprep.subr.mxu1 %v1339_v24  ;;  %1290 = vmatprep.subr.mxu0 %v1339_v24  ;;  %v717_v8 = vmul.f32 %v1328_v6, %v1412_v16  ;;  %v262_v16 = vpop.permute.xlu0 %261 }
  0xbc   : > { %1278 = vmatmul.mubr.msk.f32.vlgmr.msra.gmra.mrb[2].mxu1 %vm374_vm3, %v373_v0  ;;  %1283 = vmatmul.mubr.msk.f32.vlgmr.msra.gmra.mrb[4].mxu0 %vm374_vm3, %v715_v10  ;;  %v718_v9 = vmul.f32 %v1330_v11, %v1414_v17  ;;  %v276_v17 = vpop.permute.xlu1 %275  ;;  %v329_v19 = vmul.f32 %v312_v14, %v262_v16 }
  0xbd   : > { %1286 = vmatpush3.xpose.msk.msra.mxu1 %vm374_vm3, %v716_v2  ;;  %1291 = vmatpush3.xpose.msk.msra.mxu0 %vm374_vm3, %v717_v8  ;;  %v331_v23 = vmul.f32 %v320_v20, %v276_v17 }
  0xbe   : > { %1287 = vmatprep.mubr.msk.f32.mxu1 %vm1340_vm1, %v1339_v24  ;;  %1292 = vmatprep.mubr.msk.f32.mxu0 %vm1340_vm1, %v1339_v24  ;;  %vm333_vm4 = vcmp.eq.f32.partialorder %v329_v19, 4.0 }
  0xbf   : > { %1295 = vmatprep.subr.mxu1 %v1339_v24  ;;  %v1208_v34 = vsel %vm333_vm4, 1.0, %v1339_v24  ;;  %vm335_vm7 = vcmp.eq.f32.partialorder %v331_v23, 4.0 }
  0xc0   : > { %1288 = vmatmul.mubr.msk.f32.vlgmr.msra.gmra.mrb[4].mxu1 %vm374_vm3, %v716_v2  ;;  %1293 = vmatmul.mubr.msk.f32.vlgmr.msra.gmra.mrb[6].mxu0 %vm374_vm3, %v717_v8  ;;  %v283_v30 = vpop.permute.xlu1 %282  ;;  %v1210_v40 = vsel %vm335_vm7, 1.0, %v1339_v24 }
  0xc1   : > { %1296 = vmatpush3.xpose.msk.msra.mxu1 %vm374_vm3, %v718_v9  ;;  %1297 = vmatprep.mubr.msk.f32.mxu1 %vm1340_vm1, %v1339_v24  ;;  %v332_v36 = vmul.f32 %v324_v25, %v283_v30 }
  0xc3   : > { %vm336_vm10 = vcmp.eq.f32.partialorder %v332_v36, 4.0 }
  0xc4   : > { %1298 = vmatmul.mubr.msk.f32.vlgmr.msra.gmra.mrb[6].mxu1 %vm374_vm3, %v718_v9  ;;  %v1211_v52 = vsel %vm336_vm10, 1.0, %v1339_v24 }
 0x187   : > { %v444_v27 = vpop.f32.mrb[0].mxu0 }
 0x188   : > { %vm667_vm5 = vcmp.ne.f32.partialorder %v444_v27, 0.0  ;;  %v1264_v31 = vpop.f32.mrb[1].mxu0 }
 0x189   : > { %v1220_v32 = vsel %vm667_vm5, 1.0, %v1339_v24  ;;  %vm1081_vm5 = vcmask 0  }
 0x18a   : > { %v679_v35 = vmul.f32 %v1220_v32, %v1513_v26 }
 0x18b   : > { %v517_v33 = vpop.f32.mrb[0].mxu1  ;;  %v590_v37 = vpop.f32.mrb[2].mxu0 }
 0x18c   : > { %v683_v38 = vmul.f32 %v1208_v34, %v679_v35  ;;  %vm668_vm8 = vcmp.ne.f32.partialorder %v517_v33, 0.0  ;;  %vm669_vm9 = vcmp.ne.f32.partialorder %v590_v37, 0.0  ;;  %v1269_v28 = vpop.f32.mrb[1].mxu1  ;;  %v1274_v29 = vpop.f32.mrb[3].mxu0 }
 0x18d   : > { %v1221_v41 = vsel %vm668_vm8, 1.0, %v1339_v24  ;;  %v1222_v42 = vsel %vm669_vm9, 1.0, %v1339_v24 }
 0x18e   : > { %v687_v43 = vmul.f32 %v683_v38, %v444_v27  ;;  %v680_v44 = vmul.f32 %v1221_v41, %v1513_v26  ;;  %v681_v45 = vmul.f32 %v1222_v42, %v1513_v26 }
 0x18f   : > { %v663_v46 = vpop.f32.mrb[2].mxu1  ;;  %v788_v47 = vpop.f32.mrb[4].mxu0 }
 0x190   : > { %v684_v48 = vmul.f32 %v1209_v39, %v680_v44  ;;  %v685_v49 = vmul.f32 %v1210_v40, %v681_v45  ;;  %vm670_vm11 = vcmp.ne.f32.partialorder %v663_v46, 0.0  ;;  %vm1011_vm12 = vcmp.ne.f32.partialorder %v788_v47, 0.0  ;;  %v1279_v50 = vpop.f32.mrb[3].mxu1  ;;  %v1284_v51 = vpop.f32.mrb[5].mxu0 }
 0x191   : > { %v1223_v53 = vsel %vm670_vm11, 1.0, %v1339_v24  ;;  %v1232_v54 = vsel %vm1011_vm12, 1.0, %v1339_v24 }
 0x192   : > { %v688_v55 = vmul.f32 %v684_v48, %v517_v33  ;;  %v689_v56 = vmul.f32 %v685_v49, %v590_v37  ;;  %v682_v57 = vmul.f32 %v1223_v53, %v1513_v26  ;;  %v1023_v58 = vmul.f32 %v1232_v54, %v1513_v26 }
 0x193   : > { %v861_v59 = vpop.f32.mrb[4].mxu1  ;;  %v934_v60 = vpop.f32.mrb[6].mxu0 }
 0x194   : > { %v686_v61 = vmul.f32 %v1211_v52, %v682_v57  ;;  %v1027_v62 = vmul.f32 %v1208_v34, %v1023_v58  ;;  %vm1012_vm13 = vcmp.ne.f32.partialorder %v861_v59, 0.0  ;;  %vm1013_vm14 = vcmp.ne.f32.partialorder %v934_v60, 0.0  ;;  %v1289_v63 = vpop.f32.mrb[5].mxu1  ;;  %v1294_v3 = vpop.f32.mrb[7].mxu0 }
 0x195   : > { %v1233_v4 = vsel %vm1012_vm13, 1.0, %v1339_v24  ;;  %v1234_v5 = vsel %vm1013_vm14, 1.0, %v1339_v24 }
 0x196   : > { %v690_v0 = vmul.f32 %v686_v61, %v663_v46  ;;  %v1031_v7 = vmul.f32 %v1027_v62, %v788_v47  ;;  %v1024_v1 = vmul.f32 %v1233_v4, %v1513_v26  ;;  %v1025_v10 = vmul.f32 %v1234_v5, %v1513_v26 }
 0x197   : > { %v1007_v2 = vpop.f32.mrb[6].mxu1  ;;  %v1083_v9 = vsel %vm1063_vm15, %v1027_v62, 0.0 }
 0x198   : > { %v1035_v6 = vsub.f32 %v1031_v7, %v687_v43  ;;  %v1028_v11 = vmul.f32 %v1209_v39, %v1024_v1  ;;  %vm1014_vm0 = vcmp.ne.f32.partialorder %v1007_v2, 0.0  ;;  %v1299_v8 = vpop.f32.mrb[7].mxu1  ;;  %v1029_v12 = vmul.f32 %v1210_v40, %v1025_v10 }
 0x199   : > { %v1235_v13 = vsel %vm1014_vm0, 1.0, %v1339_v24 }
 0x19a   : > { %v1039_v14 = vand.u32 2147483647, %v1035_v6  ;;  %v1047_v15 = vmul.f32 0.5, %v1035_v6  ;;  %v1032_v16 = vmul.f32 %v1028_v11, %v861_v59  ;;  %v1084_v17 = vsel %vm1063_vm15, %v1028_v11, 0.0 }
 0x19b   : > { %v1033_v18 = vmul.f32 %v1029_v12, %v934_v60  ;;  %v1026_v19 = vmul.f32 %v1235_v13, %v1513_v26  ;;  %v1085_v20 = vadd.f32 %v1084_v17, %v1083_v9  ;;  %v1086_v21 = vsel %vm1063_vm15, %v1029_v12, 0.0 }
 0x19c   : > { %v1051_v22 = vmul.f32 %v1047_v15, %v1035_v6  ;;  %v1236_v23 = vadd.f32 -0.5, %v1039_v14  ;;  %v1036_v25 = vsub.f32 %v1032_v16, %v688_v55  ;;  %vm1538_vm1 = vcmp.lt.f32.partialorder %v1039_v14, 1.0 }
 0x19d   : > { %v1037_v30 = vsub.f32 %v1033_v18, %v689_v56  ;;  %v1030_v24 = vmul.f32 %v1211_v52, %v1026_v19  ;;  %v1087_v31 = vadd.f32 %v1086_v21, %v1085_v20 }
 0x19e   : > { %v1040_v32 = vand.u32 2147483647, %v1036_v25  ;;  %v1048_v34 = vmul.f32 0.5, %v1036_v25  ;;  %v1059_v35 = vsel %vm1538_vm1, %v1051_v22, %v1236_v23 }
 0x19f   : > { %v1041_v36 = vand.u32 2147483647, %v1037_v30  ;;  %v1049_v26 = vmul.f32 0.5, %v1037_v30  ;;  %v1034_v33 = vmul.f32 %v1030_v24, %v1007_v2  ;;  %v1088_v37 = vsel %vm1063_vm15, %v1030_v24, 0.0 }
 0x1a0   : > { %v1052_v38 = vmul.f32 %v1048_v34, %v1036_v25  ;;  %v1237_v28 = vadd.f32 -0.5, %v1040_v32  ;;  %v1089_v29 = vadd.f32 %v1088_v37, %v1087_v31  ;;  %vm1044_vm2 = vcmp.lt.f32.partialorder %v1040_v32, 1.0 }
 0x1a1   : > { %v1053_v39 = vmul.f32 %v1049_v26, %v1037_v30  ;;  %v1038_v40 = vsub.f32 %v1034_v33, %v690_v0  ;;  %vm1045_vm3 = vcmp.lt.f32.partialorder %v1041_v36, 1.0  ;;  %v1238_v41 = vadd.f32 -0.5, %v1041_v36 }
 0x1a2   : > { %1090 = vadd.xlane.f32.xlu1 %v1089_v29  ;;  %v1060_v42 = vsel %vm1044_vm2, %v1052_v38, %v1237_v28  ;;  %v1064_v43 = vsel %vm1063_vm15, %v1059_v35, 0.0 }
 0x1a3   : > { %v1050_v44 = vmul.f32 0.5, %v1038_v40  ;;  %v1042_v45 = vand.u32 2147483647, %v1038_v40  ;;  %v1061_v46 = vsel %vm1045_vm3, %v1053_v39, %v1238_v41  ;;  %v1065_v47 = vsel %vm1063_vm15, %v1060_v42, 0.0 }
 0x1a4   : > { %v1066_v48 = vadd.f32 %v1065_v47, %v1064_v43  ;;  %v1067_v51 = vsel %vm1063_vm15, %v1061_v46, 0.0 }
 0x1a5   : > { %vm1046_vm4 = vcmp.lt.f32.partialorder %v1042_v45, 1.0  ;;  %v1054_v49 = vmul.f32 %v1050_v44, %v1038_v40  ;;  %v1239_v50 = vadd.f32 -0.5, %v1042_v45 }
 0x1a6   : > { %v1068_v52 = vadd.f32 %v1067_v51, %v1066_v48 }
 0x1a7   : > { %v1062_v53 = vsel %vm1046_vm4, %v1054_v49, %v1239_v50 }
 0x1a8   : > { %v1069_v54 = vsel %vm1063_vm15, %v1062_v53, 0.0 }
 0x1a9   : > { %v1070_v55 = vadd.f32 %v1069_v54, %v1068_v52 }
 0x1ab   : > { %1071 = vadd.xlane.f32.xlu0 %v1070_v55 }
 0x22f   : > { %v1091_v56 = vpop.xlane.xlu1 %1090 }
 0x230   : > { %v1092_v57 = vrot.slane %v1091_v56, 4 }
 0x232   : > { %v1093_v58 = vadd.f32 %v1092_v57, %v1091_v56 }
 0x234   : > { %v1094_v59 = vrot.slane %v1093_v58, 2 }
 0x236   : > { %v1095_v63 = vadd.f32 %v1094_v59, %v1093_v58 }
 0x238   : > { %v1072_v60 = vpop.xlane.xlu0 %1071  ;;  %v1096_v5 = vrot.slane %v1095_v63, 1 }
 0x239   : > { %v1073_v61 = vrot.slane %v1072_v60, 4 }
 0x23a   : > { %v1097_v1 = vadd.f32 %v1096_v5, %v1095_v63 }
 0x23b   : > { %v1074_v62 = vadd.f32 %v1073_v61, %v1072_v60 }
 0x23d   : > { %v1075_v3 = vrot.slane %v1074_v62, 2 }
 0x23f   : > { %v1076_v4 = vadd.f32 %v1075_v3, %v1074_v62 }
 0x241   : > { %v1077_v0 = vrot.slane %v1076_v4, 1 }
 0x243   : > { %v1078_v7 = vadd.f32 %v1077_v0, %v1076_v4 }
 0x245   : > { %1300 = vpush %v1078_v7 }
 0x246   : > { %1302 = vpush %v1097_v1 }
 0x276   : > { %s1301_s5 = spop %1300 }
 0x277   : > { %v1080_v10 = vstv %s1301_s5  ;;  %s1303_s9 = spop %1302 }
 0x278   : > { %1082 = vst.msk [vmem:[%s236_s30] sm:$0x1] %vm1081_vm5, %v1080_v10  ;;  %v1099_v2 = vstv %s1303_s9 }
 0x279   : > { %1100 = vst.msk [vmem:[%s239_s8] sm:$0x1] %vm1081_vm5, %v1099_v2 }
 0x27a PF: > { %s15_s15 = sadd.s32 1, %s1337_s15  }
 0x27b   : > { %p12_p4 = scmp.ge.s32.totalorder %s15_s15, 4  }
 0x27d   :  { %14 = sbr.rel (!%p12_p4) target bundleno = 1 (0x1), region = 80 }

</bundles_post_ra>
